<compile_context>
chip_gen: v7x
topology: tpu7x:2x2x1
jax: 0.10.0
libtpu: 0.0.40
codegen_flags: <defaults>
</compile_context>

<pallas_src>
import functools

import jax
import jax.numpy as jnp
from jax import lax
from jax.experimental import pallas as pl
from jax.experimental.pallas import tpu as pltpu


def _wasserstein1d_kernel(data_ref, out_ref, *, n, m, p):
    """Batched body: TB samples per grid step.

    data_ref : (TB, 2K) f32 row slab per sample:
               [0, K)      cumsum of normalized x-weights, zero-padded to K
               [K, K+n)    sorted x
               [K+n, 2K)   sorted y
    out_ref  : (1, TB) f32  W_p^p per sample (lane-dense slab)

    Assumes non-negative x-weights (as in POT): cumulative weights are
    monotone and >= 0, so the predecessor default of 0.0 is valid.
    """
    K = n + m
    TB = data_ref.shape[0]
    f32 = jnp.float32

    data = data_ref[...]                                 # (TB, 2K)
    ucum = data[:, :K]                                   # (TB, K), first n lanes valid
    xs = data[:, K:K + n]                                # (TB, n) sorted x
    ys = data[:, K + n:]                                 # (TB, m) sorted y

    # --- merged (unsorted) breakpoint multiset q.
    # k <  n : u_cum[k]            (host cumsum)
    # k >= n : v_cum[k-n] = (k-n+1)/m
    k_row = lax.broadcasted_iota(jnp.int32, (TB, K), 1)
    v_row = (k_row - (n - 1)).astype(f32) / float(m)
    q = jnp.where(k_row < n, ucum, v_row)                # (TB, K)

    # Column copy is derived from the SAME value -> bit-identical to the row
    # copy, which keeps the stable tie-break exact.
    q_col = q[:, :, None]                                # (TB, K, 1)
    q_row = q[:, None, :]                                # (TB, 1, K)

    # --- single (TB, K, K) comparison mask, reused everywhere.
    li = lax.broadcasted_iota(jnp.int32, (TB, K, K), 1)  # "other" breakpoint l
    ki = lax.broadcasted_iota(jnp.int32, (TB, K, K), 2)  # "this"  breakpoint k
    less = q_col < q_row                                 # [b, l, k]: q_l < q_k
    # Stable tie-break by original index; exact float equality is fine (any
    # mismatch only affects zero-length segments, delta == 0).
    cand = less | ((q_col == q_row) & (li < ki))         # l sorts strictly before k

    # --- quantile functions: searchsorted(cum, q_k, 'left') == count(cum < q_k).
    # Rows l < n of `less` compare against u_cum, rows l >= n against v_cum.
    idx_u = jnp.minimum(
        jnp.sum((less & (li < n)).astype(jnp.int32), axis=1), n - 1)     # (TB, K)
    idx_v = jnp.minimum(
        jnp.sum((less & (li >= n)).astype(jnp.int32), axis=1), m - 1)    # (TB, K)

    row_n = lax.broadcasted_iota(jnp.int32, (TB, n, K), 1)
    u_quant = jnp.sum(jnp.where(row_n == idx_u[:, None, :], xs[:, :, None], 0.0),
                      axis=1)                            # (TB, K)
    row_m = lax.broadcasted_iota(jnp.int32, (TB, m, K), 1)
    v_quant = jnp.sum(jnp.where(row_m == idx_v[:, None, :], ys[:, :, None], 0.0),
                      axis=1)                            # (TB, K)

    diff = jnp.abs(u_quant - v_quant)
    if p == 1:
        diffp = diff
    elif p == 2:
        diffp = diff * diff
    elif float(p).is_integer():
        diffp = diff ** int(p)
    else:
        diffp = jnp.power(diff, f32(p))

    # --- delta_k = q_k - predecessor(q_k); predecessor = max over candidate
    # breakpoints, default 0.0 (valid because all cumulative weights >= 0).
    pred = jnp.max(jnp.where(cand, q_col, 0.0), axis=1)  # (TB, K)
    delta = q - pred

    out_ref[...] = jnp.sum(delta * diffp, axis=1)[None, :]   # (1, TB) lane-dense


def _pick_batch_tile(B):
    """Multiple of 8, <= 128, and keeps >= 2 grid steps when B allows (v7x: 2 TCs)."""
    if B <= 8:
        return 8
    tb = -(-B // 2)                 # ceil(B/2) -> at least two batch tiles
    tb = ((tb + 7) // 8) * 8        # round up to sublane multiple
    return min(128, tb)


def wasserstein_1d_pallas(x, y, x_weights, p, *, batch_tile=None):
    """W_p^p between empirical 1-D distributions.

    Accepts (n,)/(m,) (matches the torch module) or batched (B,n)/(B,m).
    """
    x = jnp.asarray(x, jnp.float32)
    y = jnp.asarray(y, jnp.float32)
    xw = jnp.asarray(x_weights, jnp.float32)

    single = (x.ndim == 1)
    if single:
        x, y, xw = x[None], y[None], xw[None]
    B, n = x.shape
    m = y.shape[1]
    K = n + m
    W = K + n + m                   # ucum (K-padded) | xs | ys

    # Host-side glue: weight normalization + sorting + O(n) cumsum.
    # TODO(synk): sorting has no Pallas/Mosaic primitive; argsort stays in JAX.
    # (No guard for an all-zero weight vector, to match the torch module.)
    xw = xw / jnp.sum(xw, axis=-1, keepdims=True)
    order = jnp.argsort(x, axis=-1)
    xs = jnp.take_along_axis(x, order, axis=-1)
    xw = jnp.take_along_axis(xw, order, axis=-1)
    ys = jnp.sort(y, axis=-1)
    ucum = jnp.cumsum(xw, axis=-1)                       # (B, n)
    ucum_pad = jnp.pad(ucum, ((0, 0), (0, m)))           # (B, K), tail don't-care

    # One row-major slab per sample -> a single input stream instead of four.
    slab = jnp.concatenate([ucum_pad, xs, ys], axis=-1)  # (B, W)

    TB = batch_tile if batch_tile is not None else _pick_batch_tile(B)
    assert TB % 8 == 0
    G = pl.cdiv(B, TB)
    B_pad = G * TB
    if B_pad != B:
        slab = jnp.pad(slab, ((0, B_pad - B), (0, 0)))   # zero rows -> W_p^p == 0

    out = pl.pallas_call(
        functools.partial(_wasserstein1d_kernel, n=n, m=m, p=p),
        out_shape=jax.ShapeDtypeStruct((G, 1, TB), jnp.float32),
        grid=(G,),
        in_specs=[pl.BlockSpec((TB, W), lambda g: (g, 0))],
        out_specs=pl.BlockSpec((None, 1, TB), lambda g: (g, 0, 0)),
        compiler_params=pltpu.CompilerParams(
            dimension_semantics=("parallel",)),          # v7x: 2 TCs split batch tiles
    )(slab)

    out = out.reshape(B_pad)[:B]
    return out[0] if single else out


def wasserstein_1d_ref(x, y, x_weights, p):
    """Pure-JAX mirror of ot.wasserstein_1d for verification (single sample)."""
    n, m = x.shape[0], y.shape[0]
    xw = x_weights / jnp.sum(x_weights)
    yw = jnp.ones((m,), jnp.float32) / m
    xo = jnp.argsort(x)
    xs, xw = x[xo], xw[xo]
    ys = jnp.sort(y)
    ucw = jnp.cumsum(xw)
    vcw = jnp.cumsum(yw)
    qs = jnp.sort(jnp.concatenate([ucw, vcw]))
    uq = xs[jnp.clip(jnp.searchsorted(ucw, qs, side="left"), 0, n - 1)]
    vq = ys[jnp.clip(jnp.searchsorted(vcw, qs, side="left"), 0, m - 1)]
    qs_pad = jnp.concatenate([jnp.zeros((1,), qs.dtype), qs])
    delta = qs_pad[1:] - qs_pad[:-1]
    d = jnp.abs(uq - vq)
    if p == 1:
        return jnp.sum(delta * d)
    if float(p).is_integer():
        return jnp.sum(delta * d ** int(p))
    return jnp.sum(delta * jnp.power(d, float(p)))


if __name__ == "__main__":
    key = jax.random.PRNGKey(0)
    k1, k2, k3 = jax.random.split(key, 3)
    B, n, m = 16, 16, 8
    p = 2  # WassersteinLossMacro(p=2)

    x = jax.random.normal(k1, (B, n), jnp.float32)
    y = jax.random.normal(k2, (B, m), jnp.float32) * 1.5 + 0.3
    x_weights = jax.random.uniform(k3, (B, n), jnp.float32, minval=0.1, maxval=1.0)

    # Batched call: TB=8 samples per grid step -> grid of 2 parallel batch tiles.
    out = wasserstein_1d_pallas(x, y, x_weights, p)
    out = jax.block_until_ready(out)
    ref = jnp.stack([wasserstein_1d_ref(x[b], y[b], x_weights[b], p) for b in range(B)])
    assert jnp.allclose(out, ref, rtol=1e-5, atol=1e-6), (out, ref)

    # Single-sample call (matches the torch module signature).
    out1 = wasserstein_1d_pallas(x[0], y[0], x_weights[0], p)
    out1 = jax.block_until_ready(out1)
    assert jnp.allclose(out1, ref[0], rtol=1e-5, atol=1e-6), (out1, ref[0])

    print("KERNEL_OK")
</pallas_src>

<mosaic_0001>
module attributes {stable_mosaic.version = 11 : i64} {
  func.func @_wasserstein1d_kernel(%arg0: i32, %arg1: memref<8x48xf32, #tpu.memory_space<vmem>>, %arg2: memref<1x1x8xf32, #tpu.memory_space<vmem>>) attributes {dimension_semantics = [#tpu.dimension_semantics<parallel>], iteration_bounds = array<i64: 2>, scalar_prefetch = 0 : i64, scratch_operands = 0 : i64, tpu.core_type = #tpu.core_type<tc>, window_params = [{transform_indices = @transform_0, window_bounds = array<i64: 8, 48>}, {transform_indices = @transform_1, window_bounds = array<i64: 1, 1, 8>}]} {
    %c0 = arith.constant 0 : index
    %c0_0 = arith.constant 0 : index
    %0 = vector.load %arg1[%c0, %c0_0] : memref<8x48xf32, #tpu.memory_space<vmem>>, vector<8x48xf32>
    %1 = vector.extract_strided_slice %0 {offsets = [0, 0], sizes = [8, 24], strides = [1, 1]} : vector<8x48xf32> to vector<8x24xf32>
    %2 = vector.extract_strided_slice %0 {offsets = [0, 24], sizes = [8, 16], strides = [1, 1]} : vector<8x48xf32> to vector<8x16xf32>
    %3 = vector.extract_strided_slice %0 {offsets = [0, 40], sizes = [8, 8], strides = [1, 1]} : vector<8x48xf32> to vector<8x8xf32>
    %4 = tpu.iota {dimensions = array<i32: 1>} : vector<8x24xi32>
    %c15_i32 = arith.constant 15 : i32
    %5 = vector.broadcast %c15_i32 : i32 to vector<8x24xi32>
    %6 = arith.subi %4, %5 : vector<8x24xi32>
    %7 = arith.sitofp %6 : vector<8x24xi32> to vector<8x24xf32>
    %cst = arith.constant 8.000000e+00 : f32
    %8 = vector.broadcast %cst : f32 to vector<8x24xf32>
    %9 = arith.divf %7, %8 : vector<8x24xf32>
    %c16_i32 = arith.constant 16 : i32
    %10 = vector.broadcast %c16_i32 : i32 to vector<8x24xi32>
    %11 = arith.cmpi slt, %4, %10 : vector<8x24xi32>
    %12 = arith.select %11, %1, %9 : vector<8x24xi1>, vector<8x24xf32>
    %13 = vector.shape_cast %12 : vector<8x24xf32> to vector<8x24x1xf32>
    %14 = vector.shape_cast %12 : vector<8x24xf32> to vector<8x1x24xf32>
    %15 = tpu.iota {dimensions = array<i32: 1>} : vector<8x24x24xi32>
    %16 = tpu.iota {dimensions = array<i32: 2>} : vector<8x24x24xi32>
    %17 = vector.broadcast %13 : vector<8x24x1xf32> to vector<8x24x24xf32>
    %18 = vector.broadcast %14 : vector<8x1x24xf32> to vector<8x24x24xf32>
    %19 = arith.cmpf olt, %17, %18 : vector<8x24x24xf32>
    %20 = vector.broadcast %13 : vector<8x24x1xf32> to vector<8x24x24xf32>
    %21 = vector.broadcast %14 : vector<8x1x24xf32> to vector<8x24x24xf32>
    %22 = arith.cmpf oeq, %20, %21 : vector<8x24x24xf32>
    %23 = arith.cmpi slt, %15, %16 : vector<8x24x24xi32>
    %24 = arith.andi %22, %23 : vector<8x24x24xi1>
    %25 = arith.ori %19, %24 : vector<8x24x24xi1>
    %c16_i32_1 = arith.constant 16 : i32
    %26 = vector.broadcast %c16_i32_1 : i32 to vector<8x24x24xi32>
    %27 = arith.cmpi slt, %15, %26 : vector<8x24x24xi32>
    %28 = arith.andi %19, %27 : vector<8x24x24xi1>
    %29 = arith.extui %28 : vector<8x24x24xi1> to vector<8x24x24xi32>
    %cst_2 = arith.constant dense<0> : vector<8x24xi32>
    %30 = vector.multi_reduction <add>, %29, %cst_2 [1] : vector<8x24x24xi32> to vector<8x24xi32>
    %c15_i32_3 = arith.constant 15 : i32
    %31 = vector.broadcast %c15_i32_3 : i32 to vector<8x24xi32>
    %32 = arith.minsi %30, %31 : vector<8x24xi32>
    %c16_i32_4 = arith.constant 16 : i32
    %33 = vector.broadcast %c16_i32_4 : i32 to vector<8x24x24xi32>
    %34 = arith.cmpi sge, %15, %33 : vector<8x24x24xi32>
    %35 = arith.andi %19, %34 : vector<8x24x24xi1>
    %36 = arith.extui %35 : vector<8x24x24xi1> to vector<8x24x24xi32>
    %cst_5 = arith.constant dense<0> : vector<8x24xi32>
    %37 = vector.multi_reduction <add>, %36, %cst_5 [1] : vector<8x24x24xi32> to vector<8x24xi32>
    %c7_i32 = arith.constant 7 : i32
    %38 = vector.broadcast %c7_i32 : i32 to vector<8x24xi32>
    %39 = arith.minsi %37, %38 : vector<8x24xi32>
    %40 = tpu.iota {dimensions = array<i32: 1>} : vector<8x16x24xi32>
    %41 = vector.shape_cast %32 : vector<8x24xi32> to vector<8x1x24xi32>
    %42 = vector.broadcast %41 : vector<8x1x24xi32> to vector<8x16x24xi32>
    %43 = arith.cmpi eq, %40, %42 : vector<8x16x24xi32>
    %44 = vector.shape_cast %2 : vector<8x16xf32> to vector<8x16x1xf32>
    %cst_6 = arith.constant 0.000000e+00 : f32
    %45 = vector.shape_cast %44 : vector<8x16x1xf32> to vector<8x16x1xf32>
    %46 = vector.broadcast %45 : vector<8x16x1xf32> to vector<8x16x24xf32>
    %47 = vector.broadcast %cst_6 : f32 to vector<8x16x24xf32>
    %48 = arith.select %43, %46, %47 : vector<8x16x24xi1>, vector<8x16x24xf32>
    %cst_7 = arith.constant dense<0.000000e+00> : vector<8x24xf32>
    %49 = vector.multi_reduction <add>, %48, %cst_7 [1] : vector<8x16x24xf32> to vector<8x24xf32>
    %50 = tpu.iota {dimensions = array<i32: 1>} : vector<8x8x24xi32>
    %51 = vector.shape_cast %39 : vector<8x24xi32> to vector<8x1x24xi32>
    %52 = vector.broadcast %51 : vector<8x1x24xi32> to vector<8x8x24xi32>
    %53 = arith.cmpi eq, %50, %52 : vector<8x8x24xi32>
    %54 = vector.shape_cast %3 : vector<8x8xf32> to vector<8x8x1xf32>
    %cst_8 = arith.constant 0.000000e+00 : f32
    %55 = vector.shape_cast %54 : vector<8x8x1xf32> to vector<8x8x1xf32>
    %56 = vector.broadcast %55 : vector<8x8x1xf32> to vector<8x8x24xf32>
    %57 = vector.broadcast %cst_8 : f32 to vector<8x8x24xf32>
    %58 = arith.select %53, %56, %57 : vector<8x8x24xi1>, vector<8x8x24xf32>
    %cst_9 = arith.constant dense<0.000000e+00> : vector<8x24xf32>
    %59 = vector.multi_reduction <add>, %58, %cst_9 [1] : vector<8x8x24xf32> to vector<8x24xf32>
    %60 = arith.subf %49, %59 : vector<8x24xf32>
    %61 = math.absf %60 : vector<8x24xf32>
    %62 = arith.mulf %61, %61 : vector<8x24xf32>
    %cst_10 = arith.constant 0.000000e+00 : f32
    %63 = vector.shape_cast %13 : vector<8x24x1xf32> to vector<8x24x1xf32>
    %64 = vector.broadcast %63 : vector<8x24x1xf32> to vector<8x24x24xf32>
    %65 = vector.broadcast %cst_10 : f32 to vector<8x24x24xf32>
    %66 = arith.select %25, %64, %65 : vector<8x24x24xi1>, vector<8x24x24xf32>
    %cst_11 = arith.constant dense<0xFF800000> : vector<8x24xf32>
    %67 = vector.multi_reduction <maximumf>, %66, %cst_11 [1] : vector<8x24x24xf32> to vector<8x24xf32>
    %68 = arith.subf %12, %67 : vector<8x24xf32>
    %69 = arith.mulf %68, %62 : vector<8x24xf32>
    %cst_12 = arith.constant dense<0.000000e+00> : vector<8xf32>
    %70 = vector.multi_reduction <add>, %69, %cst_12 [1] : vector<8x24xf32> to vector<8xf32>
    %71 = vector.shape_cast %70 : vector<8xf32> to vector<1x8xf32>
    %c0_13 = arith.constant 0 : index
    %c0_14 = arith.constant 0 : index
    %c0_15 = arith.constant 0 : index
    %72 = vector.load %arg2[%c0_13, %c0_14, %c0_15] : memref<1x1x8xf32, #tpu.memory_space<vmem>>, vector<1x1x8xf32>
    %73 = vector.shape_cast %72 : vector<1x1x8xf32> to vector<1x8xf32>
    %74 = vector.shape_cast %71 : vector<1x8xf32> to vector<1x1x8xf32>
    tpu.vector_store %arg2[%c0_13, %c0_14, %c0_15], %74 {strides = array<i32>} : memref<1x1x8xf32, #tpu.memory_space<vmem>>, vector<1x1x8xf32>,
    return
  }
  func.func @transform_0(%arg0: i32) -> (i32, i32) {
    %c0_i32 = arith.constant 0 : i32
    %c0_i32_0 = arith.constant 0 : i32
    return %arg0, %c0_i32 : i32, i32
  }
  func.func @transform_1(%arg0: i32) -> (i32, i32, i32) {
    %c0_i32 = arith.constant 0 : i32
    %c0_i32_0 = arith.constant 0 : i32
    %c0_i32_1 = arith.constant 0 : i32
    return %arg0, %c0_i32, %c0_i32_0 : i32, i32, i32
  }
}

</mosaic_0001>

<bundles_post_ra>
// kernel: tpu_custom_call.1
= control target key start
LH: loop header
LB: loop body
LE: loop exit
PB: predicated region body
PF: predicated region fallthrough
CT: control target
= control target key end

     0   :  { %6 = vsyncpa [#allocation3], 0  ;;  %s2300_s0 = inlined_call_operand.hbm [shape: f32[16,48], index: 0, kind: input, shape index: {}]   ;;  %s2301_s1 = inlined_call_operand.hbm [shape: f32[2,1,8], index: 1, kind: output, shape index: {}]  }
   0x1   :  { %8 = vsyncpa [#allocation3 + $0x1], 0 }
   0x2   :  { %9 = vsyncpa [#allocation4], 0 }
   0x3   :  { %11 = vsyncpa [#allocation4 + $0x1], 0  ;;  %s1506_s6 = smov 0   ;;  %s1508_s7 = smov 0  }
   0x4   :  { %s1510_s8 = smov 0   ;;  %s1512_s9 = smov 0  }
   0x5 LB: > { %s1527_s10 = sadd.s32 4294967295, %s1490_s9   ;;  %s1335_s11 = sadd.s32 4294967294, %s1490_s9   ;;  %s1490_s9 = sphi %s1512_s9, %s2338_s9   ;;  %s1486_s8 = sphi %s1510_s8, %s2337_s8   ;;  %s1482_s7 = sphi %s1508_s7, %s2336_s7   ;;  %s1478_s6 = sphi %s1506_s6, %s2335_s6  }
   0x6   : > { %s1531_s12 = sadd.s32 1, %s1490_s9   ;;  %s24_s13 = sadd.s32 1, %s1486_s8 }
   0x7   : > { %s21_s14 = ssub.s32 %s1490_s9, %s1531_s12  ;;  %p31_p0 = scmp.ne.s32.totalorder %s1486_s8, %s1482_s7 }
   0x8   : > { %p22_p1 = scmp.eq.s32.totalorder %s21_s14, 0  ;;  %p32_p2 = scmp.eq.s32.totalorder %s1490_s9, 0 }
   0x9   : > { %p37_p3 = scmp.ne.s32.totalorder %s1482_s7, %s1478_s6  ;;  %p38_p4 = scmp.eq.s32.totalorder %s1527_s10, 0 }
   0xa   : > { %s1543_s15 = scalar_select %p22_p1, %s1486_s8, %s24_s13  }
   0xb   : > { %p1545_p5 = por %p32_p2, %p31_p0  ;;  %p1549_p6 = por %p38_p4, %p37_p3 }
   0xc   : > { %p61_p7 = scmp.eq.s32.totalorder %s1527_s10, 1  ;;  %p67_p8 = scmp.eq.s32.totalorder %s1335_s11, 1 }
   0xd   : > { %p1358_p10 = scmp.lt.s32.totalorder %s1490_s9, 2  ;;  %s87_s20 = sand.u32 1, %s1486_s8  }
   0xe   : > { %p1556_p11 = por %p61_p7, %p31_p0  ;;  %p1560_p12 = por %p67_p8, %p37_p3 }
   0xf   : > { %s1339_s21 = sshll.u32 %s1490_s9, 7  ;;  %s1338_s22 = sshll.u32 %s87_s20, 3 }
  0x10   : > { %s2305_s18 = scalar_select %p1556_p11, 1, 0 }
  0x11   : > { %s2306_s19 = scalar_select %p1560_p12, 1, 0 }
  0x12   : > { %s1569_s25 = scalar_lea.hbm %s2300_s0, %s1339_s21  ;;  %s91_s26 = scalar_lea.vmem [#allocation2], %s1338_s22 }
  0x13   : > { %s98_s27 = sshll.u32 %s91_s26, 4  ;;  %p1573_p13 = pnand %p1358_p10, %p1545_p5  ;;  %s1577_s27 = int_to_ptr.vmem [resolvable:$true] %s98_s27 }
  0x14   : > { %s88_s29 = scalar_lea.sflag [#allocation3], %s87_s20  ;;  %s1394_s30 = scalar_lea.hbm %s1569_s25, 128 }
  0x15   : > { %p1395_p2 = scmp.ne.s32.totalorder %s1569_s25, %s1394_s30  ;;  %p1396_p3 = pneg %p1573_p13 }
  0x16   : > { %s1399_s4 = scalar_lea.hbm %s2300_s0, 256  ;;  %p1400_p5 = scmp.lt.u32.totalorder %s1569_s25, %s2300_s0 }
  0x17   : > { %p1397_p4 = pnand %p1396_p3, %p1395_p2  ;;  %p1401_p8 = scmp.lt.u32.totalorder %s1399_s4, %s1394_s30 }
  0x18   : > { %p1403_p9 = scmp.lt.u32.totalorder %s1394_s30, %s1569_s25 }
  0x19   : > { %p1398_p7 = pneg %p1397_p4  ;;  %p1402_p10 = por %p1401_p8, %p1400_p5 }
  0x1b   : > { %p1404_p0 = por %p1403_p9, %p1402_p10 }
  0x1d   : > { %p1405_p1 = pnand %p1404_p0, %p1398_p7 }
  0x1f   : > { %1408 = shalt.err (!%p1405_p1)
}
  0x20   : > { %s1409_s13 = scalar_lea.vmem %s1577_s27, 128  ;;  %s1492_s14 = smov [#allocation2]  }
  0x21   : > { %p1410_p2 = scmp.ne.s32.totalorder %s1577_s27, %s1409_s13  ;;  %s1414_s16 = sshll.u32 %s1492_s14, 4  ;;  %s1415_s16 = int_to_ptr.vmem [resolvable:$false] %s1414_s16 }
  0x22   : > { %s1416_s20 = scalar_lea.vmem %s1415_s16, 256  ;;  %p1417_p11 = scmp.lt.s32.totalorder %s1577_s27, %s1415_s16 }
  0x23   : > { %p1412_p4 = pnand %p1410_p2, %p1396_p3  ;;  %p1418_p5 = scmp.lt.s32.totalorder %s1416_s20, %s1409_s13 }
  0x25   : > { %p1413_p12 = pneg %p1412_p4  ;;  %p1419_p8 = por %p1418_p5, %p1417_p11 }
  0x27   : > { %p1420_p9 = pnand %p1419_p8, %p1413_p12 }
  0x29   : > { %1423 = shalt.err (!%p1420_p9)
}
  0x2a   : > { %1353 = dma.hbm_to_vmem [thread:$0]  (!%p1573_p13), %s1569_s25, 128, %s1577_s27, %s88_s29  }
  0x2b   : > { %p2308_p0 = scmp.lt.s32.totalorder %s1490_s9, 3  ;;  %p2309_p1 = scmp.ge.s32.totalorder %s1490_s9, 1 }
  0x2d   : > { %p104_p3 = pnand %p2309_p1, %p2308_p0 }
  0x2e   : > { %s1611_s21 = sand.u32 (!%p104_p3), 1, %s1482_s7  }
  0x2f   : > { %107 = sbr.rel (%p104_p3) target bundleno = 502 (0x1f6), region = 24  ;;  %s1341_s22 = sshll.u32 (!%p104_p3), %s1611_s21, 3 }
  0x30   : > { %s110_s23 = scalar_lea.sflag (!%p104_p3), [#allocation3], %s1611_s21  ;;  %s113_s24 = scalar_lea.vmem (!%p104_p3), [#allocation2], %s1341_s22 }
  0x36   : > { %1469 = dma.done.wait (%p1549_p6), %s110_s23, 128  }
  0x37   : > { %1471 = vsyncadd (%p1549_p6), %s110_s23, 4294967168  ;;  %v132_v0 = vlaneseq  ;;  %v1624_v5 = vld [vmem:[%s113_s24] sm:$0xff]  ;;  %v1493_v32 = vmov 1966171168   ;;  %vm504_vm6 = vcmask 195584   ;;  %v1494_v57 = vmov 0  }
  0x38   : > { %v263_v33 = vunpack.c.l.s4 %v1493_v32  ;;  %s1343_s17 = sshll.u32 %s1527_s10, 4  ;;  %s130_s25 = scalar_lea.vmem [#allocation5], %s1611_s21 }
  0x39   : > { %v1619_v1 = vand.u32 127, %v132_v0  ;;  %v1621_v2 = vshrl.u32 %v132_v0, 7  ;;  %s1269_s26 = sshll.u32 %s130_s25, 4  ;;  %s2256_s29 = scalar_lea.hbm %s2301_s1, %s1343_s17  ;;  %s2258_s26 = int_to_ptr.vmem [resolvable:$true] %s1269_s26 }
  0x3a   : > { %v264_v34 = vunpack.c.0.s8 %v263_v33  ;;  %s1257_s30 = scalar_lea.sflag [#allocation4], %s1611_s21  ;;  %s1424_s2 = scalar_lea.vmem %s2258_s26, 16 }
  0x3b   : > { %v1342_v3 = vadd.s32 4294967281, %v1619_v1  ;;  %vm138_vm0 = vcmp.lt.s32.totalorder %v1619_v1, 16  ;;  %v157_v6 = vsub.s32 1, %v1621_v2  ;;  %v1629_v7 = vsub.s32 0, %v1621_v2  ;;  %p1425_p6 = scmp.ne.s32.totalorder %s2258_s26, %s1424_s2  ;;  %p2332_p11 = scmp.ne.s32.totalorder %s2305_s18, 0 }
  0x3c   : > { %v172_v12 = vsub.s32 2, %v1621_v2  ;;  %v187_v14 = vsub.s32 3, %v1621_v2  ;;  %v202_v16 = vsub.s32 4, %v1621_v2  ;;  %v217_v18 = vsub.s32 5, %v1621_v2  ;;  %s1495_s10 = smov [#allocation5]  }
  0x3d   : > { %v135_v4 = vcvt.s32.f32 %v1342_v3  ;;  %v232_v20 = vsub.s32 6, %v1621_v2  ;;  %v247_v22 = vsub.s32 7, %v1621_v2  ;;  %v783_v24 = vrot.slane %v1624_v5, %v1629_v7  ;;  %p1426_p12 = pnand %p1425_p6, %p2332_p11  ;;  %s1428_s3 = sshll.u32 %s1495_s10, 4  ;;  %s1429_s3 = int_to_ptr.vmem [resolvable:$false] %s1428_s3 }
  0x3e   : > { %v795_v25 = vrot.slane %v1624_v5, %v157_v6  ;;  %v807_v26 = vrot.slane %v1624_v5, %v172_v12  ;;  %v819_v27 = vrot.slane %v1624_v5, %v187_v14  ;;  %v831_v28 = vrot.slane %v1624_v5, %v202_v16  ;;  %s1430_s4 = scalar_lea.vmem %s1429_s3, 32  ;;  %p1431_p7 = scmp.lt.s32.totalorder %s2258_s26, %s1429_s3 }
  0x3f   : > { %v137_v8 = vmul.f32 0.125, %v135_v4  ;;  %v843_v29 = vrot.slane %v1624_v5, %v217_v18  ;;  %v855_v30 = vrot.slane %v1624_v5, %v232_v20  ;;  %v867_v31 = vrot.slane %v1624_v5, %v247_v22  ;;  %p1427_p13 = pneg %p1426_p12  ;;  %p1432_p10 = scmp.lt.s32.totalorder %s1430_s4, %s1424_s2 }
  0x40   : > { %v267_v35 = vsub.s32 %v264_v34, %v1621_v2  ;;  %vm1670_vm1 = vcmp.lt.s32.totalorder %v1621_v2, %v1619_v1  ;;  %v1675_v45 = vadd.s32 8, %v1621_v2  ;;  %v313_v56 = vadd.s32 16, %v1621_v2 }
  0x41   : > { %v1632_v9 = vsel %vm138_vm0, %v1624_v5, %v137_v8  ;;  %p1433_p2 = por %p1432_p10, %p1431_p7 }
  0x42   : > { %v158_v10 = vrot.slane %v1632_v9, %v157_v6  ;;  %v143_v11 = vrot.slane %v1632_v9, %v1629_v7  ;;  %v173_v13 = vrot.slane %v1632_v9, %v172_v12  ;;  %v188_v15 = vrot.slane %v1632_v9, %v187_v14 }
  0x43   : > { %v203_v17 = vrot.slane %v1632_v9, %v202_v16  ;;  %v218_v19 = vrot.slane %v1632_v9, %v217_v18  ;;  %v233_v21 = vrot.slane %v1632_v9, %v232_v20  ;;  %v248_v23 = vrot.slane %v1632_v9, %v247_v22  ;;  %p1434_p4 = pnand %p1433_p2, %p1427_p13 }
  0x44   : > { %160 = vbcast.lane.b32.xlu1 %v158_v10, 256  ;;  %145 = vbcast.lane.b32.xlu0 %v143_v11, 256  ;;  %v268_v36 = vrot.slane %v1632_v9, %v267_v35  ;;  %v261_v38 = vcombine.high %v1632_v9, %v1632_v9  ;;  %vm1691_vm9 = vcmp.lt.s32.totalorder %v1675_v45, %v1619_v1 }
  0x46   : > { %v276_v37 = vcombine.high %v268_v36, %v268_v36  ;;  %v284_v40 = vrot.slane %v268_v36, %v267_v35  ;;  %v275_v41 = vrot.slane %v261_v38, %v267_v35 }
  0x48   : > { %164 = vbcast.lane.b32.xlu1 %v158_v10, 264  ;;  %149 = vbcast.lane.b32.xlu0 %v143_v11, 264  ;;  %v298_v39 = vrot.slane %v276_v37, %v267_v35  ;;  %v1666_v43 = vrot.slane %v284_v40, %v1629_v7  ;;  %v306_v46 = vcombine.high %v284_v40, %v284_v40 }
  0x49   : > { %v1677_v47 = vrot.slane %v275_v41, %v267_v35  ;;  %v277_v51 = vcombine.high %v275_v41, %v275_v41 }
  0x4a   : > { %v1663_v42 = vrot.slane %v298_v39, %v1629_v7  ;;  %v308_v50 = vcombine.high %v298_v39, %v298_v39  ;;  %v1696_v54 = vrot.slane %v306_v46, %v1629_v7 }
  0x4b   : > { %v1700_v55 = vrot.slane %v1677_v47, %v1629_v7  ;;  %v305_v3 = vrot.slane %v277_v51, %v267_v35  ;;  %v307_v18 = vcombine.high %v1677_v47, %v1677_v47 }
  0x4c   : > { %179 = vbcast.lane.b32.xlu1 %v173_v13, 264  ;;  %175 = vbcast.lane.b32.xlu0 %v173_v13, 256  ;;  %v1712_v63 = vrot.slane %v308_v50, %v1629_v7 }
  0x4d   : > { %v1780_v33 = vrot.slane %v307_v18, %v1629_v7 }
  0x50   : > { %194 = vbcast.lane.b32.xlu1 %v188_v15, 264  ;;  %190 = vbcast.lane.b32.xlu0 %v188_v15, 256 }
  0x54   : > { %209 = vbcast.lane.b32.xlu1 %v203_v17, 264  ;;  %205 = vbcast.lane.b32.xlu0 %v203_v17, 256 }
  0x58   : > { %168 = vbcast.lane.b32.xlu1 %v158_v10, 272  ;;  %153 = vbcast.lane.b32.xlu0 %v143_v11, 272 }
  0x5c   : > { %224 = vbcast.lane.b32.xlu1 %v218_v19, 264  ;;  %220 = vbcast.lane.b32.xlu0 %v218_v19, 256 }
  0x60   : > { %235 = vbcast.lane.b32.xlu1 %v233_v21, 256  ;;  %183 = vbcast.lane.b32.xlu0 %v173_v13, 272 }
  0x64   : > { %198 = vbcast.lane.b32.xlu1 %v188_v15, 272  ;;  %239 = vbcast.lane.b32.xlu0 %v233_v21, 264 }
  0x68   : > { %254 = vbcast.lane.b32.xlu1 %v248_v23, 264  ;;  %250 = vbcast.lane.b32.xlu0 %v248_v23, 256 }
  0x6c   : > { %228 = vbcast.lane.b32.xlu1 %v218_v19, 272  ;;  %213 = vbcast.lane.b32.xlu0 %v203_v17, 272 }
  0x70   : > { %258 = vbcast.lane.b32.xlu1 %v248_v23, 272  ;;  %243 = vbcast.lane.b32.xlu0 %v233_v21, 272  ;;  %v309_v23 = vcombine.high %v305_v3, %v305_v3 }
  0x72   : > { %v1797_v37 = vrot.slane %v309_v23, %v1629_v7 }
  0x74   : > { %790 = vbcast.lane.b32.xlu1 %v783_v24, 288  ;;  %786 = vbcast.lane.b32.xlu0 %v783_v24, 280 }
  0x78   : > { %802 = vbcast.lane.b32.xlu1 %v795_v25, 288  ;;  %798 = vbcast.lane.b32.xlu0 %v795_v25, 280 }
  0x7c   : > { %814 = vbcast.lane.b32.xlu1 %v807_v26, 288  ;;  %810 = vbcast.lane.b32.xlu0 %v807_v26, 280 }
  0x80   : > { %826 = vbcast.lane.b32.xlu1 %v819_v27, 288  ;;  %822 = vbcast.lane.b32.xlu0 %v819_v27, 280 }
  0x84   : > { %978 = vbcast.lane.b32.xlu1 %v795_v25, 296  ;;  %974 = vbcast.lane.b32.xlu0 %v783_v24, 296 }
  0x88   : > { %838 = vbcast.lane.b32.xlu1 %v831_v28, 288  ;;  %834 = vbcast.lane.b32.xlu0 %v831_v28, 280 }
  0x8c   : > { %846 = vbcast.lane.b32.xlu1 %v843_v29, 280  ;;  %982 = vbcast.lane.b32.xlu0 %v807_v26, 296 }
  0x90   : > { %986 = vbcast.lane.b32.xlu1 %v819_v27, 296  ;;  %850 = vbcast.lane.b32.xlu0 %v843_v29, 288  ;;  %v1772_v27 = vrot.slane %v305_v3, %v1629_v7 }
  0x94   : > { %862 = vbcast.lane.b32.xlu1 %v855_v30, 288  ;;  %858 = vbcast.lane.b32.xlu0 %v855_v30, 280 }
  0x98   : > { %870 = vbcast.lane.b32.xlu1 %v867_v31, 280  ;;  %990 = vbcast.lane.b32.xlu0 %v831_v28, 296 }
  0x9c   : > { %994 = vbcast.lane.b32.xlu1 %v843_v29, 296  ;;  %874 = vbcast.lane.b32.xlu0 %v867_v31, 288 }
  0xa0   : > { %1002 = vbcast.lane.b32.xlu1 %v867_v31, 296  ;;  %998 = vbcast.lane.b32.xlu0 %v855_v30, 296 }
  0xb6   : > { %v161_v48 = vpop.permute.xlu1 %160  ;;  %v146_v49 = vpop.permute.xlu0 %145 }
  0xb7   : > { %vm357_vm2 = vcmp.lt.f32.partialorder %v161_v48, %v1663_v42  ;;  %vm381_vm3 = vcmp.eq.f32.partialorder %v161_v48, %v1663_v42  ;;  %vm354_vm4 = vcmp.lt.f32.partialorder %v146_v49, %v1666_v43  ;;  %vm378_vm5 = vcmp.eq.f32.partialorder %v146_v49, %v1666_v43 }
  0xb8   : > { %vm408_vm7 = vmand %vm381_vm3, %vm1670_vm1  ;;  %v483_v58 = vsel %vm357_vm2, 1, %v1494_v57  ;;  %v480_v60 = vsel %vm354_vm4, 1, %v1494_v57 }
  0xb9   : > { %vm1685_vm8 = vmor %vm357_vm2, %vm408_vm7  ;;  %v516_v8 = vsel %vm504_vm6, %v483_v58, 0  ;;  %v505_v10 = vsel %vm504_vm6, %v480_v60, 0 }
  0xba   : > { %v1095_v59 = vsel %vm1685_vm8, %v161_v48, 0.0  ;;  %vm405_vm10 = vmand %vm378_vm5, %vm1670_vm1  ;;  %v165_v61 = vpop.permute.xlu1 %164  ;;  %v150_v62 = vpop.permute.xlu0 %149 }
  0xbb   : > { %vm1716_vm11 = vmor %vm354_vm4, %vm405_vm10  ;;  %vm358_vm12 = vcmp.lt.f32.partialorder %v165_v61, %v1663_v42  ;;  %vm382_vm13 = vcmp.eq.f32.partialorder %v165_v61, %v1663_v42  ;;  %vm355_vm14 = vcmp.lt.f32.partialorder %v150_v62, %v1666_v43  ;;  %vm379_vm0 = vcmp.eq.f32.partialorder %v150_v62, %v1666_v43 }
  0xbc   : > { %v1092_v4 = vsel %vm1716_vm11, %v146_v49, 0.0  ;;  %vm409_vm15 = vmand %vm382_vm13, %vm1691_vm9  ;;  %v484_v5 = vsel %vm358_vm12, 1, %v1494_v57  ;;  %v481_v6 = vsel %vm355_vm14, 1, %v1494_v57  ;;  %v1745_v19 = vsel %vm504_vm6, %v1095_v59, -inf }
  0xbd   : > { %vm433_vm2 = vmor %vm358_vm12, %vm409_vm15  ;;  %v517_v11 = vsel %vm504_vm6, %v484_v5, 0  ;;  %v506_v12 = vsel %vm504_vm6, %v481_v6, 0  ;;  %v1760_v24 = vsel %vm504_vm6, %v1092_v4, -inf  ;;  %vm1767_vm13 = vcmp.lt.s32.totalorder %v313_v56, %v1619_v1 }
  0xbe   : > { %v1736_v13 = vadd.s32 %v517_v11, %v516_v8  ;;  %v1096_v14 = vsel %vm433_vm2, %v165_v61, 0.0  ;;  %vm406_vm3 = vmand %vm379_vm0, %vm1691_vm9  ;;  %v1740_v15 = vadd.s32 %v506_v12, %v505_v10  ;;  %v180_v16 = vpop.permute.xlu1 %179  ;;  %v176_v17 = vpop.permute.xlu0 %175 }
  0xbf   : > { %v1748_v20 = vsel %vm504_vm6, %v1096_v14, -inf  ;;  %vm430_vm4 = vmor %vm355_vm14, %vm406_vm3  ;;  %vm361_vm5 = vcmp.lt.f32.partialorder %v180_v16, %v1696_v54  ;;  %vm385_vm7 = vcmp.eq.f32.partialorder %v180_v16, %v1696_v54  ;;  %vm360_vm10 = vcmp.lt.f32.partialorder %v176_v17, %v1696_v54 }
  0xc0   : > { %v1129_v21 = vmax.f32 %v1745_v19, %v1748_v20  ;;  %v1093_v22 = vsel %vm430_vm4, %v150_v62, 0.0  ;;  %vm412_vm8 = vmand %vm385_vm7, %vm1691_vm9  ;;  %vm384_vm12 = vcmp.eq.f32.partialorder %v176_v17, %v1696_v54  ;;  %v487_v29 = vsel %vm361_vm5, 1, %v1494_v57 }
  0xc1   : > { %v1763_v25 = vsel %vm504_vm6, %v1093_v22, -inf  ;;  %vm436_vm11 = vmor %vm361_vm5, %vm412_vm8  ;;  %v486_v35 = vsel %vm360_vm10, 1, %v1494_v57  ;;  %v521_v38 = vrot.slane %v1736_v13, 4  ;;  %v510_v39 = vrot.slane %v1740_v15, 4 }
  0xc2   : > { %v1118_v28 = vmax.f32 %v1760_v24, %v1763_v25  ;;  %v1099_v30 = vsel %vm436_vm11, %v180_v16, 0.0  ;;  %vm411_vm14 = vmand %vm384_vm12, %vm1670_vm1  ;;  %v195_v31 = vpop.permute.xlu1 %194  ;;  %v191_v32 = vpop.permute.xlu0 %190  ;;  %v528_v40 = vsel %vm504_vm6, %v487_v29, 0  ;;  %v527_v46 = vsel %vm504_vm6, %v486_v35, 0 }
  0xc3   : > { %v1783_v34 = vsel %vm504_vm6, %v1099_v30, -inf  ;;  %vm435_vm15 = vmor %vm360_vm10, %vm411_vm14  ;;  %vm364_vm0 = vcmp.lt.f32.partialorder %v195_v31, %v1712_v63  ;;  %vm388_vm2 = vcmp.eq.f32.partialorder %v195_v31, %v1712_v63  ;;  %vm363_vm4 = vcmp.lt.f32.partialorder %v191_v32, %v1712_v63 }
  0xc4   : > { %v1098_v36 = vsel %vm435_vm15, %v176_v17, 0.0  ;;  %vm415_vm3 = vmand %vm388_vm2, %vm1691_vm9  ;;  %vm387_vm5 = vcmp.eq.f32.partialorder %v191_v32, %v1712_v63  ;;  %v490_v48 = vsel %vm364_vm0, 1, %v1494_v57  ;;  %v489_v52 = vsel %vm363_vm4, 1, %v1494_v57 }
  0xc5   : > { %v1803_v41 = vsel %vm504_vm6, %v1098_v36, -inf  ;;  %vm439_vm7 = vmor %vm364_vm0, %vm415_vm3  ;;  %v1826_v59 = vadd.s32 %v528_v40, %v527_v46  ;;  %v539_v60 = vsel %vm504_vm6, %v490_v48, 0  ;;  %v538_v0 = vsel %vm504_vm6, %v489_v52, 0 }
  0xc6   : > { %v1140_v47 = vmax.f32 %v1803_v41, %v1783_v34  ;;  %v1102_v49 = vsel %vm439_vm7, %v195_v31, 0.0  ;;  %vm414_vm8 = vmand %vm387_vm5, %vm1670_vm1  ;;  %v210_v7 = vpop.permute.xlu1 %209  ;;  %v206_v50 = vpop.permute.xlu0 %205  ;;  %v1862_v18 = vadd.s32 %v510_v39, %v1740_v15  ;;  %v1864_v22 = vadd.s32 %v539_v60, %v538_v0 }
  0xc7   : > { %v1812_v51 = vsel %vm504_vm6, %v1102_v49, -inf  ;;  %vm438_vm10 = vmor %vm363_vm4, %vm414_vm8  ;;  %vm367_vm11 = vcmp.lt.f32.partialorder %v210_v7, %v1700_v55  ;;  %vm391_vm12 = vcmp.eq.f32.partialorder %v210_v7, %v1700_v55  ;;  %vm366_vm15 = vcmp.lt.f32.partialorder %v206_v50, %v1700_v55 }
  0xc8   : > { %v1101_v56 = vsel %vm438_vm10, %v191_v32, 0.0  ;;  %vm418_vm14 = vmand %vm391_vm12, %vm1691_vm9  ;;  %v493_v58 = vsel %vm367_vm11, 1, %v1494_v57  ;;  %vm390_vm0 = vcmp.eq.f32.partialorder %v206_v50, %v1700_v55  ;;  %v492_v62 = vsel %vm366_vm15, 1, %v1494_v57 }
  0xc9   : > { %v1830_v61 = vsel %vm504_vm6, %v1101_v56, -inf  ;;  %vm442_vm2 = vmor %vm367_vm11, %vm418_vm14  ;;  %v550_v4 = vsel %vm504_vm6, %v493_v58, 0  ;;  %v549_v11 = vsel %vm504_vm6, %v492_v62, 0  ;;  %v532_v16 = vrot.slane %v1826_v59, 4 }
  0xca   : > { %v1151_v3 = vmax.f32 %v1830_v61, %v1812_v51  ;;  %v1105_v5 = vsel %vm442_vm2, %v210_v7, 0.0  ;;  %vm417_vm3 = vmand %vm390_vm0, %vm1670_vm1  ;;  %v169_v6 = vpop.permute.xlu1 %168  ;;  %v154_v8 = vpop.permute.xlu0 %153  ;;  %v1871_v35 = vadd.s32 %v550_v4, %v549_v11  ;;  %v522_v26 = vadd.s32 %v521_v38, %v1736_v13 }
  0xcb   : > { %v1842_v10 = vsel %vm504_vm6, %v1105_v5, -inf  ;;  %vm441_vm4 = vmor %vm366_vm15, %vm417_vm3  ;;  %vm359_vm5 = vcmp.lt.f32.partialorder %v169_v6, %v1663_v42  ;;  %vm383_vm7 = vcmp.eq.f32.partialorder %v169_v6, %v1663_v42  ;;  %vm356_vm10 = vcmp.lt.f32.partialorder %v154_v8, %v1666_v43 }
  0xcc   : > { %v1104_v12 = vsel %vm441_vm4, %v206_v50, 0.0  ;;  %vm410_vm8 = vmand %vm383_vm7, %vm1767_vm13  ;;  %v641_v14 = vsel %vm359_vm5, 1, %v1494_v57  ;;  %vm380_vm11 = vcmp.eq.f32.partialorder %v154_v8, %v1666_v43  ;;  %v638_v42 = vsel %vm356_vm10, 1, %v1494_v57 }
  0xcd   : > { %v1856_v17 = vsel %vm504_vm6, %v1104_v12, -inf  ;;  %vm434_vm12 = vmor %vm359_vm5, %vm410_vm8  ;;  %v674_v29 = vsel %vm504_vm6, %v641_v14, 0  ;;  %v663_v39 = vsel %vm504_vm6, %v638_v42, 0  ;;  %v543_v14 = vrot.slane %v1864_v22, 4 }
  0xce   : > { %v1162_v23 = vmax.f32 %v1856_v17, %v1842_v10  ;;  %v1097_v30 = vsel %vm434_vm12, %v169_v6, 0.0  ;;  %vm407_vm14 = vmand %vm380_vm11, %vm1767_vm13  ;;  %v225_v31 = vpop.permute.xlu1 %224  ;;  %v221_v32 = vpop.permute.xlu0 %220  ;;  %v676_v48 = vrot.slane %v674_v29, 4  ;;  %v665_v56 = vrot.slane %v663_v39, 4 }
  0xcf   : > { %v1130_v36 = vsel %vm504_vm6, %v1097_v30, -inf  ;;  %vm431_vm15 = vmor %vm356_vm10, %vm407_vm14  ;;  %vm370_vm0 = vcmp.lt.f32.partialorder %v225_v31, %v1772_v27  ;;  %vm394_vm2 = vcmp.eq.f32.partialorder %v225_v31, %v1772_v27  ;;  %vm369_vm5 = vcmp.lt.f32.partialorder %v221_v32, %v1772_v27 }
  0xd0   : > { %v1131_v15 = vmax.f32 %v1129_v21, %v1130_v36  ;;  %v1094_v40 = vsel %vm431_vm15, %v154_v8, 0.0  ;;  %vm421_vm3 = vmand %vm394_vm2, %vm1691_vm9  ;;  %v496_v46 = vsel %vm370_vm0, 1, %v1494_v57  ;;  %vm393_vm7 = vcmp.eq.f32.partialorder %v221_v32, %v1772_v27 }
  0xd1   : > { %v1119_v43 = vsel %vm504_vm6, %v1094_v40, -inf  ;;  %vm1886_vm4 = vmor %vm370_vm0, %vm421_vm3  ;;  %v561_v7 = vsel %vm504_vm6, %v496_v46, 0  ;;  %v495_v58 = vsel %vm369_vm5, 1, %v1494_v57  ;;  %vm1212_vm14 = vcmask 1041409  }
  0xd2   : > { %v1132_v19 = vrot.slane %v1131_v15, 4  ;;  %v1120_v20 = vmax.f32 %v1118_v28, %v1119_v43  ;;  %v1108_v21 = vsel %vm1886_vm4, %v225_v31, 0.0  ;;  %v1898_v50 = vpop.permute.xlu1 %235  ;;  %v184_v52 = vpop.permute.xlu0 %183  ;;  %vm420_vm8 = vmand %vm393_vm7, %vm1670_vm1  ;;  %v560_v60 = vsel %vm504_vm6, %v495_v58, 0 }
  0xd3   : > { %vm372_vm10 = vcmp.lt.f32.partialorder %v1898_v50, %v1780_v33  ;;  %vm396_vm11 = vcmp.eq.f32.partialorder %v1898_v50, %v1780_v33  ;;  %v1910_v28 = vsel %vm504_vm6, %v1108_v21, -inf  ;;  %vm444_vm12 = vmor %vm369_vm5, %vm420_vm8  ;;  %v1915_v62 = vadd.s32 %v561_v7, %v560_v60 }
  0xd4   : > { %v1133_v24 = vmax.f32 %v1131_v15, %v1132_v19  ;;  %v1121_v25 = vrot.slane %v1120_v20, 4  ;;  %v1107_v0 = vsel %vm444_vm12, %v221_v32, 0.0  ;;  %v498_v4 = vsel %vm372_vm10, 1, %v1494_v57  ;;  %vm423_vm0 = vmand %vm396_vm11, %vm1670_vm1 }
  0xd5   : > { %vm362_vm15 = vcmp.lt.f32.partialorder %v184_v52, %v1696_v54  ;;  %v1923_v8 = vsel %vm504_vm6, %v1107_v0, -inf  ;;  %vm386_vm2 = vcmp.eq.f32.partialorder %v184_v52, %v1696_v54  ;;  %v554_v42 = vrot.slane %v1871_v35, 4  ;;  %vm1946_vm5 = vmor %vm372_vm10, %vm423_vm0 }
  0xd6   : > { %v1134_v5 = vrot.slane %v1133_v24, 2  ;;  %v1122_v6 = vmax.f32 %v1120_v20, %v1121_v25  ;;  %v199_v11 = vpop.permute.xlu1 %198  ;;  %v1928_v12 = vpop.permute.xlu0 %239  ;;  %v1173_v30 = vmax.f32 %v1923_v8, %v1910_v28  ;;  %vm413_vm3 = vmand %vm386_vm2, %vm1767_vm13  ;;  %v512_v31 = vrot.slane %v1862_v18, 2 }
  0xd7   : > { %v1937_v32 = vadd.s32 %v676_v48, %v674_v29  ;;  %v1939_v15 = vadd.s32 %v665_v56, %v663_v39  ;;  %vm437_vm4 = vmor %vm362_vm15, %vm413_vm3  ;;  %v571_v43 = vsel %vm504_vm6, %v498_v4, 0  ;;  %vm365_vm7 = vcmp.lt.f32.partialorder %v199_v11, %v1712_v63 }
  0xd8   : > { %v1135_v36 = vmax.f32 %v1133_v24, %v1134_v5  ;;  %v1123_v40 = vrot.slane %v1122_v6, 2  ;;  %v1100_v49 = vsel %vm437_vm4, %v184_v52, 0.0  ;;  %vm389_vm8 = vcmp.eq.f32.partialorder %v199_v11, %v1712_v63 }
  0xd9   : > { %v565_v48 = vrot.slane %v1915_v62, 4  ;;  %v1141_v7 = vsel %vm504_vm6, %v1100_v49, -inf  ;;  %vm416_vm11 = vmand %vm389_vm8, %vm1767_vm13  ;;  %v644_v20 = vsel %vm362_vm15, 1, %v1494_v57  ;;  %v647_v63 = vsel %vm365_vm7, 1, %v1494_v57 }
  0xda   : > { %v1136_v29 = vrot.slane %v1135_v36, 1  ;;  %v1124_v39 = vmax.f32 %v1122_v6, %v1123_v40  ;;  %v1957_v19 = vpop.permute.xlu0 %250  ;;  %v1142_v21 = vmax.f32 %v1140_v47, %v1141_v7  ;;  %vm440_vm10 = vmor %vm365_vm7, %vm416_vm11  ;;  %vm373_vm12 = vcmp.lt.f32.partialorder %v1928_v12, %v1780_v33  ;;  %v1968_v56 = vpop.permute.xlu1 %254 }
  0xdb   : > { %v1110_v25 = vsel %vm1946_vm5, %v1898_v50, 0.0  ;;  %v1103_v54 = vsel %vm440_vm10, %v199_v11, 0.0  ;;  %vm397_vm15 = vcmp.eq.f32.partialorder %v1928_v12, %v1780_v33  ;;  %v499_v34 = vsel %vm373_vm12, 1, %v1494_v57 }
  0xdc   : > { %v1137_v58 = vmax.f32 %v1135_v36, %v1136_v29  ;;  %v1125_v24 = vrot.slane %v1124_v39, 1  ;;  %v1143_v52 = vrot.slane %v1142_v21, 4  ;;  %v1152_v60 = vsel %vm504_vm6, %v1103_v54, -inf  ;;  %vm424_vm2 = vmand %vm397_vm15, %vm1691_vm9 }
  0xdd   : > { %vm1214_vm0 = vcmask 1042434   ;;  %v685_v47 = vsel %vm504_vm6, %v644_v20, 0  ;;  %v696_v0 = vsel %vm504_vm6, %v647_v63, 0  ;;  %v1153_v50 = vmax.f32 %v1151_v3, %v1152_v60  ;;  %vm1990_vm3 = vmor %vm373_vm12, %vm424_vm2 }
  0xde   : > { %v1126_v41 = vmax.f32 %v1124_v39, %v1125_v24  ;;  %v1144_v4 = vmax.f32 %v1142_v21, %v1143_v52  ;;  %v572_v6 = vsel %vm504_vm6, %v499_v34, 0  ;;  %vm376_vm4 = vcmp.lt.f32.partialorder %v1968_v56, %v1797_v37  ;;  %v214_v36 = vpop.permute.xlu0 %213  ;;  %v229_v39 = vpop.permute.xlu1 %228 }
  0xdf   : > { %vm400_vm5 = vcmp.eq.f32.partialorder %v1968_v56, %v1797_v37  ;;  %v1154_v61 = vrot.slane %v1153_v50, 4  ;;  %v1111_v3 = vsel %vm1990_vm3, %v1928_v12, 0.0  ;;  %v502_v11 = vsel %vm376_vm4, 1, %v1494_v57 }
  0xe0   : > { %v1213_v51 = vsel %vm1212_vm14, %v1137_v58, %v1126_v41  ;;  %vm427_vm7 = vmand %vm400_vm5, %vm1691_vm9  ;;  %v2010_v40 = vsel %vm504_vm6, %v1110_v25, -inf  ;;  %v687_v46 = vrot.slane %v685_v47, 4  ;;  %v1145_v49 = vrot.slane %v1144_v4, 2 }
  0xe1   : > { %v698_v29 = vrot.slane %v696_v0, 4  ;;  %v1155_v7 = vmax.f32 %v1153_v50, %v1154_v61  ;;  %v2012_v20 = vadd.s32 %v572_v6, %v571_v43  ;;  %vm2017_vm9 = vmor %vm376_vm4, %vm427_vm7  ;;  %v583_v12 = vsel %vm504_vm6, %v502_v11, 0 }
  0xe2   : > { %vm375_vm8 = vcmp.lt.f32.partialorder %v1957_v19, %v1797_v37  ;;  %v1146_v21 = vmax.f32 %v1144_v4, %v1145_v49  ;;  %v2025_v63 = vsel %vm504_vm6, %v1111_v3, -inf  ;;  %vm399_vm11 = vcmp.eq.f32.partialorder %v1957_v19, %v1797_v37  ;;  %v259_v11 = vpop.permute.xlu1 %258 }
  0xe3   : > { %v501_v43 = vsel %vm375_vm8, 1, %v1494_v57  ;;  %v1156_v58 = vrot.slane %v1155_v7, 2  ;;  %vm426_vm10 = vmand %vm399_vm11, %vm1670_vm1  ;;  %vm371_vm12 = vcmp.lt.f32.partialorder %v229_v39, %v1772_v27  ;;  %vm395_vm15 = vcmp.eq.f32.partialorder %v229_v39, %v1772_v27 }
  0xe4   : > { %v582_v24 = vsel %vm504_vm6, %v501_v43, 0  ;;  %v1147_v25 = vrot.slane %v1146_v21, 1  ;;  %v1114_v54 = vsel %vm2017_vm9, %v1968_v56, 0.0  ;;  %vm2038_vm2 = vmor %vm375_vm8, %vm426_vm10  ;;  %v653_v44 = vsel %vm371_vm12, 1, %v1494_v57  ;;  %v244_v56 = vpop.permute.xlu0 %243 }
  0xe5   : > { %v2042_v60 = vadd.s32 %v583_v12, %v582_v24  ;;  %v2047_v34 = vadd.s32 %v687_v46, %v685_v47  ;;  %v1113_v41 = vsel %vm2038_vm2, %v1957_v19, 0.0  ;;  %vm422_vm1 = vmand %vm395_vm15, %vm1767_vm13  ;;  %vm368_vm3 = vcmp.lt.f32.partialorder %v214_v36, %v1700_v55 }
  0xe6   : > { %vm392_vm4 = vcmp.eq.f32.partialorder %v214_v36, %v1700_v55  ;;  %v1148_v50 = vmax.f32 %v1146_v21, %v1147_v25  ;;  %v2056_v4 = vadd.s32 %v698_v29, %v696_v0  ;;  %v576_v5 = vrot.slane %v2012_v20, 4  ;;  %vm446_vm5 = vmor %vm371_vm12, %vm422_vm1 }
  0xe7   : > { %v718_v47 = vsel %vm504_vm6, %v653_v44, 0  ;;  %v1157_v6 = vmax.f32 %v1155_v7, %v1156_v58  ;;  %v1184_v19 = vmax.f32 %v2010_v40, %v2025_v63  ;;  %v1194_v61 = vsel %vm504_vm6, %v1114_v54, -inf  ;;  %vm419_vm7 = vmand %vm392_vm4, %vm1767_vm13 }
  0xe8   : > { %v1109_v3 = vsel %vm446_vm5, %v229_v39, 0.0  ;;  %v2068_v0 = vsel %vm1214_vm0, %v1148_v50, %v1213_v51  ;;  %v587_v46 = vrot.slane %v2042_v60, 4  ;;  %v1193_v27 = vsel %vm504_vm6, %v1113_v41, -inf  ;;  %vm443_vm9 = vmor %vm368_vm3, %vm419_vm7  ;;  %v787_v8 = vpop.permute.xlu0 %786 }
  0xe9   : > { %v1174_v49 = vsel %vm504_vm6, %v1109_v3, -inf  ;;  %v720_v40 = vrot.slane %v718_v47, 4  ;;  %v650_v39 = vsel %vm368_vm3, 1, %v1494_v57  ;;  %v1106_v51 = vsel %vm443_vm9, %v214_v36, 0.0 }
  0xea   : > { %v1175_v29 = vmax.f32 %v1173_v30, %v1174_v49  ;;  %v1163_v7 = vsel %vm504_vm6, %v1106_v51, -inf  ;;  %vm377_vm8 = vcmp.lt.f32.partialorder %v259_v11, %v1797_v37  ;;  %vm401_vm11 = vcmp.eq.f32.partialorder %v259_v11, %v1797_v37 }
  0xeb   : > { %vm374_vm10 = vcmp.lt.f32.partialorder %v244_v56, %v1780_v33  ;;  %v1195_v53 = vmax.f32 %v1193_v27, %v1194_v61  ;;  %v1164_v28 = vmax.f32 %v1162_v23, %v1163_v7  ;;  %vm428_vm12 = vmand %vm401_vm11, %vm1767_vm13  ;;  %v659_v55 = vsel %vm377_vm8, 1, %v1494_v57 }
  0xec   : > { %v1176_v12 = vrot.slane %v1175_v29, 4  ;;  %v707_v30 = vsel %vm504_vm6, %v650_v39, 0  ;;  %vm452_vm15 = vmor %vm377_vm8, %vm428_vm12  ;;  %v740_v36 = vsel %vm504_vm6, %v659_v55, 0  ;;  %vm398_vm2 = vcmp.eq.f32.partialorder %v244_v56, %v1780_v33  ;;  %v799_v27 = vpop.permute.xlu0 %798 }
  0xed   : > { %v513_v37 = vadd.s32 %v512_v31, %v1862_v18  ;;  %v1165_v10 = vrot.slane %v1164_v28, 4  ;;  %v1115_v17 = vsel %vm452_vm15, %v259_v11, 0.0  ;;  %vm425_vm1 = vmand %vm398_vm2, %vm1767_vm13  ;;  %v656_v23 = vsel %vm374_vm10, 1, %v1494_v57  ;;  %v791_v18 = vpop.permute.xlu1 %790 }
  0xee   : > { %v1177_v21 = vmax.f32 %v1175_v29, %v1176_v12  ;;  %v1158_v63 = vrot.slane %v1157_v6, 1  ;;  %v1196_v43 = vsel %vm504_vm6, %v1115_v17, -inf  ;;  %vm2105_vm3 = vmor %vm374_vm10, %vm425_vm1  ;;  %v709_v24 = vrot.slane %v707_v30, 4 }
  0xef   : > { %v514_v31 = vrot.slane %v513_v37, 1  ;;  %v1166_v25 = vmax.f32 %v1164_v28, %v1165_v10  ;;  %v742_v54 = vrot.slane %v740_v36, 4  ;;  %v1197_v52 = vmax.f32 %v1195_v53, %v1196_v43 }
  0xf0   : > { %v729_v57 = vsel %vm504_vm6, %v656_v23, 0  ;;  %v1112_v44 = vsel %vm2105_vm3, %v244_v56, 0.0  ;;  %v523_v41 = vrot.slane %v522_v26, 2  ;;  %v2115_v50 = vadd.s32 %v720_v40, %v718_v47 }
  0xf1   : > { %v515_v33 = vadd.s32 %v514_v31, %v513_v37  ;;  %v1178_v61 = vrot.slane %v1177_v21, 2  ;;  %v1167_v3 = vrot.slane %v1166_v25, 2  ;;  %v1185_v11 = vsel %vm504_vm6, %v1112_v44, -inf  ;;  %v803_v40 = vpop.permute.xlu1 %802 }
  0xf2   : > { %v2118_v49 = vmax.f32 %v1157_v6, %v1158_v63  ;;  %v1186_v13 = vmax.f32 %v1184_v19, %v1185_v11  ;;  %v524_v38 = vadd.s32 %v523_v41, %v522_v26  ;;  %v2120_v29 = vadd.s32 %v709_v24, %v707_v30  ;;  %v811_v63 = vpop.permute.xlu0 %810 }
  0xf3   : > { %vm593_vm13 = vcmp.lt.s32.totalorder %v515_v33, 15  ;;  %v1198_v39 = vrot.slane %v1197_v52, 4  ;;  %v731_v51 = vrot.slane %v729_v57, 4  ;;  %v2122_v56 = vadd.s32 %v742_v54, %v740_v36 }
  0xf4   : > { %v594_v7 = vsel %vm593_vm13, %v515_v33, 15  ;;  %v1187_v53 = vrot.slane %v1186_v13, 4  ;;  %v525_v47 = vrot.slane %v524_v38, 1  ;;  %v1179_v12 = vmax.f32 %v1177_v21, %v1178_v61 }
  0xf5   : > { %vm765_vm4 = vcmp.eq.s32.totalorder %v1675_v45, %v594_v7  ;;  %v1168_v28 = vmax.f32 %v1166_v25, %v1167_v3  ;;  %vm764_vm5 = vcmp.eq.s32.totalorder %v1621_v2, %v594_v7  ;;  %v1199_v10 = vmax.f32 %v1197_v52, %v1198_v39 }
  0xf6   : > { %v877_v55 = vsel %vm765_vm4, %v791_v18, 0.0  ;;  %v1188_v6 = vmax.f32 %v1186_v13, %v1187_v53  ;;  %v876_v30 = vsel %vm764_vm5, %v787_v8, 0.0  ;;  %v526_v37 = vadd.s32 %v525_v47, %v524_v38  ;;  %v823_v11 = vpop.permute.xlu0 %822 }
  0xf7   : > { %v893_v19 = vsel %vm504_vm6, %v877_v55, 0.0  ;;  %v2127_v17 = vadd.s32 %v731_v51, %v729_v57  ;;  %v892_v36 = vsel %vm504_vm6, %v876_v30, 0.0  ;;  %v533_v23 = vadd.s32 %v532_v16, %v1826_v59  ;;  %v815_v59 = vpop.permute.xlu1 %814 }
  0xf8   : > { %v1189_v21 = vrot.slane %v1188_v6, 2  ;;  %v894_v43 = vadd.f32 %v893_v19, %v892_v36  ;;  %vm595_vm7 = vcmp.lt.s32.totalorder %v526_v37, 15  ;;  %v544_v58 = vadd.s32 %v543_v14, %v1864_v22 }
  0xf9   : > { %v1180_v18 = vrot.slane %v1179_v12, 1  ;;  %v596_v8 = vsel %vm595_vm7, %v526_v37, 15  ;;  %v534_v31 = vrot.slane %v533_v23, 2  ;;  %v678_v26 = vrot.slane %v1937_v32, 2 }
  0xfa   : > { %v1169_v24 = vrot.slane %v1168_v28, 1  ;;  %v895_v25 = vrot.slane %v894_v43, 4  ;;  %vm767_vm9 = vcmp.eq.s32.totalorder %v1675_v45, %v596_v8  ;;  %vm766_vm8 = vcmp.eq.s32.totalorder %v1621_v2, %v596_v8 }
  0xfb   : > { %v879_v16 = vsel %vm767_vm9, %v803_v40, 0.0  ;;  %v878_v54 = vsel %vm766_vm8, %v799_v27, 0.0  ;;  %v535_v52 = vadd.s32 %v534_v31, %v533_v23  ;;  %v545_v57 = vrot.slane %v544_v58, 2  ;;  %v827_v19 = vpop.permute.xlu1 %826 }
  0xfc   : > { %v1200_v44 = vrot.slane %v1199_v10, 2  ;;  %v1190_v33 = vmax.f32 %v1188_v6, %v1189_v21  ;;  %v902_v22 = vsel %vm504_vm6, %v879_v16, 0.0  ;;  %v901_v14 = vsel %vm504_vm6, %v878_v54, 0.0 }
  0xfd   : > { %v903_v41 = vadd.f32 %v902_v22, %v901_v14  ;;  %v536_v61 = vrot.slane %v535_v52, 1  ;;  %v546_v3 = vadd.s32 %v545_v57, %v544_v58  ;;  %v679_v13 = vadd.s32 %v678_v26, %v1937_v32 }
  0xfe   : > { %v2142_v38 = vmax.f32 %v1179_v12, %v1180_v18  ;;  %v896_v39 = vadd.f32 %v895_v25, %v894_v43  ;;  %v667_v51 = vrot.slane %v1939_v15, 2  ;;  %v555_v27 = vadd.s32 %v554_v42, %v1871_v35 }
  0xff   : > { %v904_v7 = vrot.slane %v903_v41, 4  ;;  %v537_v53 = vadd.s32 %v536_v61, %v535_v52  ;;  %v547_v47 = vrot.slane %v546_v3, 1  ;;  %v680_v40 = vrot.slane %v679_v13, 1 }
 0x100   : > { %v2148_v55 = vmax.f32 %v1168_v28, %v1169_v24  ;;  %v2150_v6 = vmax.f32 %v1199_v10, %v1200_v44  ;;  %v668_v32 = vadd.s32 %v667_v51, %v1939_v15  ;;  %v556_v12 = vrot.slane %v555_v27, 2  ;;  %v975_v28 = vpop.permute.xlu0 %974 }
 0x101   : > { %v1191_v30 = vrot.slane %v1190_v33, 1  ;;  %v905_v37 = vadd.f32 %v904_v7, %v903_v41  ;;  %vm597_vm11 = vcmp.lt.s32.totalorder %v537_v53, 15  ;;  %v548_v36 = vadd.s32 %v547_v47, %v546_v3 }
 0x102   : > { %v897_v23 = vrot.slane %v896_v39, 2  ;;  %v598_v21 = vsel %vm597_vm11, %v537_v53, 15  ;;  %v681_v43 = vadd.s32 %v680_v40, %v679_v13  ;;  %v566_v35 = vadd.s32 %v565_v48, %v1915_v62  ;;  %v979_v48 = vpop.permute.xlu1 %978 }
 0x103   : > { %vm769_vm10 = vcmp.eq.s32.totalorder %v1675_v45, %v598_v21  ;;  %vm768_vm12 = vcmp.eq.s32.totalorder %v1621_v2, %v598_v21  ;;  %vm599_vm15 = vcmp.lt.s32.totalorder %v548_v36, 15  ;;  %v669_v42 = vrot.slane %v668_v32, 1 }
 0x104   : > { %v881_v15 = vsel %vm769_vm10, %v815_v59, 0.0  ;;  %v880_v10 = vsel %vm768_vm12, %v811_v63, 0.0  ;;  %v600_v58 = vsel %vm599_vm15, %v548_v36, 15  ;;  %v557_v18 = vadd.s32 %v556_v12, %v555_v27  ;;  %v835_v61 = vpop.permute.xlu0 %834 }
 0x105   : > { %v906_v8 = vrot.slane %v905_v37, 2  ;;  %v911_v31 = vsel %vm504_vm6, %v881_v15, 0.0  ;;  %v910_v26 = vsel %vm504_vm6, %v880_v10, 0.0  ;;  %vm771_vm2 = vcmp.eq.s32.totalorder %v1675_v45, %v600_v58 }
 0x106   : > { %v912_v24 = vadd.f32 %v911_v31, %v910_v26  ;;  %v883_v62 = vsel %vm771_vm2, %v827_v19, 0.0  ;;  %vm770_vm1 = vcmp.eq.s32.totalorder %v1621_v2, %v600_v58  ;;  %vm750_vm3 = vcmp.lt.s32.totalorder %v681_v43, 7 }
 0x107   : > { %v898_v25 = vadd.f32 %v897_v23, %v896_v39  ;;  %v920_v16 = vsel %vm504_vm6, %v883_v62, 0.0  ;;  %v882_v59 = vsel %vm770_vm1, %v823_v11, 0.0  ;;  %v751_v63 = vsel %vm750_vm3, %v681_v43, 7 }
 0x108   : > { %v913_v54 = vrot.slane %v912_v24, 4  ;;  %v919_v52 = vsel %vm504_vm6, %v882_v59, 0.0  ;;  %vm965_vm13 = vcmp.eq.s32.totalorder %v1621_v2, %v751_v63  ;;  %v670_v57 = vadd.s32 %v669_v42, %v668_v32  ;;  %v983_v15 = vpop.permute.xlu0 %982 }
 0x109   : > { %v1202_v44 = vrot.slane %v2150_v6, 1  ;;  %v907_v22 = vadd.f32 %v906_v8, %v905_v37  ;;  %v1005_v14 = vsel %vm965_vm13, %v979_v48, 0.0  ;;  %v558_v41 = vrot.slane %v557_v18, 1  ;;  %v839_v37 = vpop.permute.xlu1 %838 }
 0x10a   : > { %v2166_v3 = vmax.f32 %v1190_v33, %v1191_v30  ;;  %v1019_v13 = vsel %vm504_vm6, %v1005_v14, 0.0  ;;  %vm748_vm4 = vcmp.lt.s32.totalorder %v670_v57, 7  ;;  %v567_v39 = vrot.slane %v566_v35, 2 }
 0x10b   : > { %v921_v11 = vadd.f32 %v920_v16, %v919_v52  ;;  %v1020_v51 = vrot.slane %v1019_v13, 4  ;;  %v749_v27 = vsel %vm748_vm4, %v670_v57, 7  ;;  %v559_v7 = vadd.s32 %v558_v41, %v557_v18 }
 0x10c   : > { %v899_v53 = vrot.slane %v898_v25, 1  ;;  %v914_v47 = vadd.f32 %v913_v54, %v912_v24  ;;  %vm964_vm5 = vcmp.eq.s32.totalorder %v1621_v2, %v749_v27  ;;  %v568_v40 = vadd.s32 %v567_v39, %v566_v35 }
 0x10d   : > { %v908_v19 = vrot.slane %v907_v22, 1  ;;  %v1021_v32 = vadd.f32 %v1020_v51, %v1019_v13  ;;  %v1004_v12 = vsel %vm964_vm5, %v975_v28, 0.0  ;;  %vm601_vm7 = vcmp.lt.s32.totalorder %v559_v7, 15 }
 0x10e   : > { %v1012_v33 = vsel %vm504_vm6, %v1004_v12, 0.0  ;;  %v602_v30 = vsel %vm601_vm7, %v559_v7, 15  ;;  %v569_v36 = vrot.slane %v568_v40, 1  ;;  %v689_v23 = vrot.slane %v2047_v34, 2 }
 0x10f   : > { %v922_v21 = vrot.slane %v921_v11, 4  ;;  %v1022_v43 = vrot.slane %v1021_v32, 2  ;;  %v1013_v42 = vrot.slane %v1012_v33, 4  ;;  %vm773_vm9 = vcmp.eq.s32.totalorder %v1675_v45, %v602_v30 }
 0x110   : > { %v900_v10 = vadd.f32 %v899_v53, %v898_v25  ;;  %v915_v58 = vrot.slane %v914_v47, 2  ;;  %v885_v35 = vsel %vm773_vm9, %v839_v37, 0.0  ;;  %v570_v18 = vadd.s32 %v569_v36, %v568_v40  ;;  %v847_v25 = vpop.permute.xlu1 %846 }
 0x111   : > { %v1023_v8 = vadd.f32 %v1022_v43, %v1021_v32  ;;  %v1014_v28 = vadd.f32 %v1013_v42, %v1012_v33  ;;  %v929_v31 = vsel %vm504_vm6, %v885_v35, 0.0  ;;  %vm772_vm8 = vcmp.eq.s32.totalorder %v1621_v2, %v602_v30 }
 0x112   : > { %v909_v26 = vadd.f32 %v908_v19, %v907_v22  ;;  %v884_v24 = vsel %vm772_vm8, %v835_v61, 0.0  ;;  %vm603_vm11 = vcmp.lt.s32.totalorder %v570_v18, 15  ;;  %v690_v62 = vadd.s32 %v689_v23, %v2047_v34  ;;  %v851_v22 = vpop.permute.xlu0 %850 }
 0x113   : > { %v923_v48 = vadd.f32 %v922_v21, %v921_v11  ;;  %v1024_v16 = vrot.slane %v1023_v8, 1  ;;  %v1015_v59 = vrot.slane %v1014_v28, 2  ;;  %v928_v63 = vsel %vm504_vm6, %v884_v24, 0.0 }
 0x114   : > { %v930_v54 = vadd.f32 %v929_v31, %v928_v63  ;;  %v604_v52 = vsel %vm603_vm11, %v570_v18, 15  ;;  %v691_v57 = vrot.slane %v690_v62, 1  ;;  %v700_v14 = vrot.slane %v2056_v4, 2  ;;  %v987_v18 = vpop.permute.xlu1 %986 }
 0x115   : > { %v916_v41 = vadd.f32 %v915_v58, %v914_v47  ;;  %v1025_v13 = vadd.f32 %v1024_v16, %v1023_v8  ;;  %v1016_v39 = vadd.f32 %v1015_v59, %v1014_v28  ;;  %vm774_vm10 = vcmp.eq.s32.totalorder %v1621_v2, %v604_v52 }
 0x116   : > { %v931_v61 = vrot.slane %v930_v54, 4  ;;  %v886_v51 = vsel %vm774_vm10, %v847_v25, 0.0  ;;  %v692_v34 = vadd.s32 %v691_v57, %v690_v62  ;;  %v701_v11 = vadd.s32 %v700_v14, %v2056_v4 }
 0x117   : > { %v1069_v27 = vsub.f32 %v909_v26, %v1025_v13  ;;  %v1017_v7 = vrot.slane %v1016_v39, 1  ;;  %v937_v53 = vsel %vm504_vm6, %v886_v51, 0.0  ;;  %vm775_vm12 = vcmp.eq.s32.totalorder %v1675_v45, %v604_v52 }
 0x118   : > { %v932_v40 = vadd.f32 %v931_v61, %v930_v54  ;;  %vm752_vm15 = vcmp.lt.s32.totalorder %v692_v34, 7  ;;  %v702_v19 = vrot.slane %v701_v11, 1  ;;  %v887_v47 = vsel %vm775_vm12, %v851_v22, 0.0  ;;  %v863_v61 = vpop.permute.xlu1 %862 }
 0x119   : > { %v1077_v32 = vand.u32 2147483647, %v1069_v27  ;;  %v1018_v12 = vadd.f32 %v1017_v7, %v1016_v39  ;;  %v753_v37 = vsel %vm752_vm15, %v692_v34, 7  ;;  %v938_v33 = vsel %vm504_vm6, %v887_v47, 0.0  ;;  %v859_v39 = vpop.permute.xlu0 %858 }
 0x11a   : > { %v924_v30 = vrot.slane %v923_v48, 2  ;;  %vm966_vm2 = vcmp.eq.s32.totalorder %v1621_v2, %v753_v37  ;;  %v703_v36 = vadd.s32 %v702_v19, %v701_v11  ;;  %v939_v4 = vadd.f32 %v938_v33, %v937_v53 }
 0x11b   : > { %v1068_v23 = vsub.f32 %v900_v10, %v1018_v12  ;;  %v933_v21 = vrot.slane %v932_v40, 2  ;;  %v1006_v43 = vsel %vm966_vm2, %v983_v15, 0.0  ;;  %v577_v42 = vadd.s32 %v576_v5, %v2012_v20 }
 0x11c   : > { %v1085_v58 = vmul.f32 %v1077_v32, %v1077_v32  ;;  %v1026_v35 = vsel %vm504_vm6, %v1006_v43, 0.0  ;;  %vm754_vm1 = vcmp.lt.s32.totalorder %v703_v36, 7  ;;  %v940_v8 = vrot.slane %v939_v4, 4 }
 0x11d   : > { %v1076_v28 = vand.u32 2147483647, %v1068_v23  ;;  %v1027_v31 = vrot.slane %v1026_v35, 4  ;;  %v755_v26 = vsel %vm754_vm1, %v703_v36, 7  ;;  %v578_v24 = vrot.slane %v577_v42, 2 }
 0x11e   : > { %v917_v62 = vrot.slane %v916_v41, 1  ;;  %v925_v16 = vadd.f32 %v924_v30, %v923_v48  ;;  %vm967_vm3 = vcmp.eq.s32.totalorder %v1621_v2, %v755_v26  ;;  %v588_v15 = vadd.s32 %v587_v46, %v2042_v60 }
 0x11f   : > { %v1084_v10 = vmul.f32 %v1076_v28, %v1076_v28  ;;  %v1028_v20 = vadd.f32 %v1027_v31, %v1026_v35  ;;  %v1007_v5 = vsel %vm967_vm3, %v987_v18, 0.0  ;;  %v579_v59 = vadd.s32 %v578_v24, %v577_v42 }
 0x120   : > { %v934_v63 = vadd.f32 %v933_v21, %v932_v40  ;;  %v1033_v25 = vsel %vm504_vm6, %v1007_v5, 0.0  ;;  %v941_v54 = vadd.f32 %v940_v8, %v939_v4  ;;  %v589_v52 = vrot.slane %v588_v15, 2  ;;  %v991_v21 = vpop.permute.xlu0 %990 }
 0x121   : > { %v2194_v57 = vsel %vm1212_vm14, %v1085_v58, %v1084_v10  ;;  %v1029_v14 = vrot.slane %v1028_v20, 2  ;;  %v1034_v48 = vrot.slane %v1033_v25, 4  ;;  %v580_v13 = vrot.slane %v579_v59, 1 }
 0x122   : > { %v918_v22 = vadd.f32 %v917_v62, %v916_v41  ;;  %v590_v51 = vadd.s32 %v589_v52, %v588_v15  ;;  %v711_v60 = vrot.slane %v2120_v29, 2  ;;  %v722_v46 = vrot.slane %v2115_v50, 2 }
 0x123   : > { %v926_v34 = vrot.slane %v925_v16, 1  ;;  %v1030_v11 = vadd.f32 %v1029_v14, %v1028_v20  ;;  %v1035_v27 = vadd.f32 %v1034_v48, %v1033_v25  ;;  %v581_v7 = vadd.s32 %v580_v13, %v579_v59 }
 0x124   : > { %v935_v53 = vrot.slane %v934_v63, 1  ;;  %v942_v40 = vrot.slane %v941_v54, 2  ;;  %v591_v19 = vrot.slane %v590_v51, 1  ;;  %v712_v47 = vadd.s32 %v711_v60, %v2120_v29  ;;  %v871_v29 = vpop.permute.xlu1 %870  ;;  %v875_v52 = vpop.permute.xlu0 %874 }
 0x125   : > { %v1031_v32 = vrot.slane %v1030_v11, 1  ;;  %v1036_v12 = vrot.slane %v1035_v27, 2  ;;  %vm605_vm14 = vcmp.lt.s32.totalorder %v581_v7, 15  ;;  %v744_v41 = vrot.slane %v2122_v56, 2 }
 0x126   : > { %v606_v37 = vsel %vm605_vm14, %v581_v7, 15  ;;  %v592_v33 = vadd.s32 %v591_v19, %v590_v51  ;;  %v713_v30 = vrot.slane %v712_v47, 1  ;;  %v723_v36 = vadd.s32 %v722_v46, %v2115_v50 }
 0x127   : > { %v1032_v4 = vadd.f32 %v1031_v32, %v1030_v11  ;;  %v1037_v23 = vadd.f32 %v1036_v12, %v1035_v27  ;;  %vm777_vm13 = vcmp.eq.s32.totalorder %v1675_v45, %v606_v37  ;;  %vm776_vm4 = vcmp.eq.s32.totalorder %v1621_v2, %v606_v37 }
 0x128   : > { %v889_v43 = vsel %vm777_vm13, %v863_v61, 0.0  ;;  %v888_v42 = vsel %vm776_vm4, %v859_v39, 0.0  ;;  %vm607_vm5 = vcmp.lt.s32.totalorder %v592_v33, 15  ;;  %v714_v58 = vadd.s32 %v713_v30, %v712_v47  ;;  %v995_v39 = vpop.permute.xlu1 %994 }
 0x129   : > { %v927_v35 = vadd.f32 %v926_v34, %v925_v16  ;;  %v2203_v18 = vadd.f32 %v935_v53, %v934_v63  ;;  %v1070_v8 = vsub.f32 %v918_v22, %v1032_v4  ;;  %v1038_v28 = vrot.slane %v1037_v23, 1 }
 0x12a   : > { %vm1216_vm7 = vcmask 1043459   ;;  %v947_v50 = vsel %vm504_vm6, %v889_v43, 0.0  ;;  %v608_v31 = vsel %vm607_vm5, %v592_v33, 15  ;;  %vm756_vm9 = vcmp.lt.s32.totalorder %v714_v58, 7 }
 0x12b   : > { %v724_v26 = vrot.slane %v723_v36, 1  ;;  %v1078_v24 = vand.u32 2147483647, %v1070_v8  ;;  %v1039_v62 = vadd.f32 %v1038_v28, %v1037_v23  ;;  %v946_v15 = vsel %vm504_vm6, %v888_v42, 0.0 }
 0x12c   : > { %v757_v10 = vsel %vm756_vm9, %v714_v58, 7  ;;  %vm1218_vm8 = vcmask 1044484   ;;  %v2207_v20 = vadd.f32 %v942_v40, %v941_v54  ;;  %v745_v5 = vadd.s32 %v744_v41, %v2122_v56  ;;  %v1003_v37 = vpop.permute.xlu1 %1002 }
 0x12d   : > { %vm968_vm11 = vcmp.eq.s32.totalorder %v1621_v2, %v757_v10  ;;  %v725_v16 = vadd.s32 %v724_v26, %v723_v36  ;;  %v1086_v59 = vmul.f32 %v1078_v24, %v1078_v24  ;;  %v1071_v63 = vsub.f32 %v927_v35, %v1039_v62  ;;  %v999_v10 = vpop.permute.xlu0 %998 }
 0x12e   : > { %vm778_vm10 = vcmp.eq.s32.totalorder %v1621_v2, %v608_v31  ;;  %v1008_v25 = vsel %vm968_vm11, %v991_v21, 0.0  ;;  %vm1220_vm12 = vcmask 1045509   ;;  %v948_v14 = vadd.f32 %v947_v50, %v946_v15 }
 0x12f   : > { %v890_v48 = vsel %vm778_vm10, %v871_v29, 0.0  ;;  %v1040_v13 = vsel %vm504_vm6, %v1008_v25, 0.0  ;;  %vm758_vm15 = vcmp.lt.s32.totalorder %v725_v16, 7  ;;  %v1237_v54 = vsel %vm1214_vm0, %v1086_v59, %v2194_v57 }
 0x130   : > { %v1041_v22 = vrot.slane %v1040_v13, 4  ;;  %v759_v61 = vsel %vm758_vm15, %v725_v16, 7  ;;  %vm779_vm2 = vcmp.eq.s32.totalorder %v1675_v45, %v608_v31  ;;  %v1079_v56 = vand.u32 2147483647, %v1071_v63 }
 0x131   : > { %vm969_vm1 = vcmp.eq.s32.totalorder %v1621_v2, %v759_v61  ;;  %v891_v51 = vsel %vm779_vm2, %v875_v52, 0.0  ;;  %v746_v60 = vrot.slane %v745_v5, 1  ;;  %v955_v46 = vsel %vm504_vm6, %v890_v48, 0.0 }
 0x132   : > { %v1042_v34 = vadd.f32 %v1041_v22, %v1040_v13  ;;  %v1009_v11 = vsel %vm969_vm1, %v995_v39, 0.0  ;;  %v956_v27 = vsel %vm504_vm6, %v891_v51, 0.0  ;;  %v944_v7 = vrot.slane %v2207_v20, 1 }
 0x133   : > { %v1047_v53 = vsel %vm504_vm6, %v1009_v11, 0.0  ;;  %v957_v57 = vadd.f32 %v956_v27, %v955_v46  ;;  %v747_v40 = vadd.s32 %v746_v60, %v745_v5  ;;  %v949_v19 = vrot.slane %v948_v14, 4 }
 0x134   : > { %v1043_v47 = vrot.slane %v1042_v34, 2  ;;  %v1048_v45 = vrot.slane %v1047_v53, 4  ;;  %v733_v32 = vrot.slane %v2127_v17, 2  ;;  %v1087_v12 = vmul.f32 %v1079_v56, %v1079_v56 }
 0x135   : > { %v958_v41 = vrot.slane %v957_v57, 4  ;;  %vm762_vm0 = vcmp.lt.s32.totalorder %v747_v40, 7  ;;  %v1217_v33 = vsel %vm1216_vm7, %v2118_v49, %v2068_v0  ;;  %v1203_v43 = vmax.f32 %v2150_v6, %v1202_v44 }
 0x136   : > { %v1044_v30 = vadd.f32 %v1043_v47, %v1042_v34  ;;  %v1049_v36 = vadd.f32 %v1048_v45, %v1047_v53  ;;  %v763_v4 = vsel %vm762_vm0, %v747_v40, 7  ;;  %v734_v23 = vadd.s32 %v733_v32, %v2127_v17 }
 0x137   : > { %v959_v21 = vadd.f32 %v958_v41, %v957_v57  ;;  %vm971_vm3 = vcmp.eq.s32.totalorder %v1621_v2, %v763_v4  ;;  %v1219_v42 = vsel %vm1218_vm8, %v2148_v55, %v1217_v33  ;;  %vm1222_vm14 = vcmask 1046534  }
 0x138   : > { %v1045_v29 = vrot.slane %v1044_v30, 1  ;;  %v1050_v58 = vrot.slane %v1049_v36, 2  ;;  %v1011_v35 = vsel %vm971_vm3, %v1003_v37, 0.0  ;;  %v735_v8 = vrot.slane %v734_v23, 1 }
 0x139   : > { %v960_v0 = vrot.slane %v959_v21, 2  ;;  %v1061_v49 = vsel %vm504_vm6, %v1011_v35, 0.0  ;;  %v1221_v17 = vsel %vm1220_vm12, %v2142_v38, %v1219_v42  ;;  %v950_v24 = vadd.f32 %v949_v19, %v948_v14 }
 0x13a   : > { %v1046_v28 = vadd.f32 %v1045_v29, %v1044_v30  ;;  %v1051_v50 = vadd.f32 %v1050_v58, %v1049_v36  ;;  %v1062_v31 = vrot.slane %v1061_v49, 4  ;;  %v736_v26 = vadd.s32 %v735_v8, %v734_v23 }
 0x13b   : > { %v1223_v6 = vsel %vm1222_vm14, %v2166_v3, %v1221_v17  ;;  %vm1224_vm13 = vcmask 1047559   ;;  %v1238_v55 = vsel %vm1216_vm7, %v1087_v12, %v1237_v54  ;;  %v945_v38 = vadd.f32 %v944_v7, %v2207_v20 }
 0x13c   : > { %v1072_v44 = vsub.f32 %v2203_v18, %v1046_v28  ;;  %v1052_v62 = vrot.slane %v1051_v50, 1  ;;  %v1063_v15 = vadd.f32 %v1062_v31, %v1061_v49  ;;  %vm760_vm4 = vcmp.lt.s32.totalorder %v736_v26, 7 }
 0x13d   : > { %v961_v16 = vadd.f32 %v960_v0, %v959_v21  ;;  %v761_v5 = vsel %vm760_vm4, %v736_v26, 7  ;;  %v1225_v59 = vsel %vm1224_vm13, %v1203_v43, %v1223_v6  ;;  %v951_v3 = vrot.slane %v950_v24, 2 }
 0x13e   : > { %v1080_v63 = vand.u32 2147483647, %v1072_v44  ;;  %v1053_v25 = vadd.f32 %v1052_v62, %v1051_v50  ;;  %v1064_v52 = vrot.slane %v1063_v15, 2  ;;  %vm970_vm5 = vcmp.eq.s32.totalorder %v1621_v2, %v761_v5 }
 0x13f   : > { %v1010_v14 = vsel %vm970_vm5, %v999_v10, 0.0  ;;  %v962_v61 = vrot.slane %v961_v16, 1  ;;  %v952_v51 = vadd.f32 %v951_v3, %v950_v24  ;;  %v1227_v30 = vsub.f32 %v1632_v9, %v1225_v59 }
 0x140   : > { %v1088_v48 = vmul.f32 %v1080_v63, %v1080_v63  ;;  %v1073_v13 = vsub.f32 %v945_v38, %v1053_v25  ;;  %v1065_v18 = vadd.f32 %v1064_v52, %v1063_v15  ;;  %v1054_v39 = vsel %vm504_vm6, %v1010_v14, 0.0 }
 0x141   : > { %v1055_v54 = vrot.slane %v1054_v39, 4  ;;  %v963_v27 = vadd.f32 %v962_v61, %v961_v16  ;;  %v953_v53 = vrot.slane %v952_v51, 1  ;;  %v1251_v43 = vsub.s32 %v1619_v1, %v1621_v2 }
 0x142   : > { %v1081_v22 = vand.u32 2147483647, %v1073_v13  ;;  %v1066_v20 = vrot.slane %v1065_v18, 1  ;;  %v1239_v56 = vsel %vm1218_vm8, %v1088_v48, %v1238_v55  ;;  %vm1254_vm7 = vcmask 57344  }
 0x143   : > { %v1056_v60 = vadd.f32 %v1055_v54, %v1054_v39  ;;  %v954_v47 = vadd.f32 %v953_v53, %v952_v51 }
 0x144   : > { %v1089_v46 = vmul.f32 %v1081_v22, %v1081_v22  ;;  %v1067_v34 = vadd.f32 %v1066_v20, %v1065_v18 }
 0x145   : > { %v1057_v11 = vrot.slane %v1056_v60, 2 }
 0x146   : > { %v1240_v7 = vsel %vm1220_vm12, %v1089_v46, %v1239_v56  ;;  %v1075_v40 = vsub.f32 %v963_v27, %v1067_v34 }
 0x147   : > { %v1058_v57 = vadd.f32 %v1057_v11, %v1056_v60 }
 0x148   : > { %v1083_v32 = vand.u32 2147483647, %v1075_v40 }
 0x149   : > { %v1059_v19 = vrot.slane %v1058_v57, 1 }
 0x14a   : > { %v1091_v37 = vmul.f32 %v1083_v32, %v1083_v32 }
 0x14b   : > { %v1060_v45 = vadd.f32 %v1059_v19, %v1058_v57 }
 0x14d   : > { %v1074_v12 = vsub.f32 %v954_v47, %v1060_v45 }
 0x14f   : > { %v1082_v41 = vand.u32 2147483647, %v1074_v12 }
 0x151   : > { %v1090_v33 = vmul.f32 %v1082_v41, %v1082_v41 }
 0x153   : > { %v1241_v36 = vsel %vm1222_vm14, %v1090_v33, %v1240_v7 }
 0x154   : > { %v1242_v4 = vsel %vm1224_vm13, %v1091_v37, %v1241_v36 }
 0x155   : > { %v1244_v23 = vmul.f32 %v1242_v4, %v1227_v30 }
 0x157   : > { %v1245_v21 = vsel %vm504_vm6, %v1244_v23, 0.0 }
 0x158   : > { %1246 = vadd.xlane.f32.xlu0 %v1245_v21 }
 0x1e5   : > { %v1247_v42 = vpop.xlane.xlu0 %1246 }
 0x1e6   : > { %v1252_v29 = vrot.slane %v1247_v42, %v1251_v43 }
 0x1e8   : > { %1255 = vst.msk [vmem:[%s130_s25] sm:$0x1] %vm1254_vm7, %v1252_v29 }
 0x1e9   : > { %1437 = shalt.err (!%p1434_p4)
}
 0x1ea   : > { %s1438_s5 = scalar_lea.hbm %s2256_s29, 16  ;;  %s1442_s14 = scalar_lea.hbm %s2301_s1, 32 }
 0x1eb   : > { %p1439_p5 = scmp.ne.s32.totalorder %s2256_s29, %s1438_s5  ;;  %p1443_p0 = scmp.lt.u32.totalorder %s2256_s29, %s2301_s1 }
 0x1ec   : > { %p1444_p1 = scmp.lt.u32.totalorder %s1442_s14, %s1438_s5  ;;  %p1446_p6 = scmp.lt.u32.totalorder %s1438_s5, %s2256_s29 }
 0x1ed   : > { %p1440_p8 = pnand %p1439_p5, %p2332_p11 }
 0x1ee   : > { %p1445_p3 = por %p1444_p1, %p1443_p0 }
 0x1ef   : > { %p1441_p9 = pneg %p1440_p8 }
 0x1f0   : > { %p1447_p12 = por %p1446_p6, %p1445_p3 }
 0x1f2   : > { %p1448_p13 = pnand %p1447_p12, %p1441_p9 }
 0x1f4   : > { %1451 = shalt.err (!%p1448_p13)
}
 0x1f5   : > { %1348 = dma.vmem_to_hbm [thread:$0]  (%p2332_p11), %s2258_s26, 16, %s2256_s29, %s1257_s30  }
 0x1f6 PF: > { %s1281_s21 = sand.u32 1, %s1478_s6   ;;  %p2333_p7 = scmp.ne.s32.totalorder %s2306_s19, 0 }
 0x1f7   : > { %p2334_p10 = scmp.ge.s32.totalorder %s1490_s9, 2  ;;  %s1282_s22 = scalar_lea.sflag [#allocation4], %s1281_s21 }
 0x1f9   : > { %p1355_p2 = pnand %p2334_p10, %p2333_p7 }
 0x1fb   : > { %1473 = dma.done.wait (!%p1355_p2), %s1282_s22, 16  }
 0x1fc   : > { %1475 = vsyncadd (!%p1355_p2), %s1282_s22, 4294967280  ;;  %p14_p4 = scmp.ge.s32.totalorder %s1531_s12, 4   ;;  %s2335_s6 = smov %s1482_s7 }
 0x1fd   : > { %s2336_s7 = smov %s1486_s8  ;;  %s2337_s8 = smov %s1543_s15 }
 0x1fe   : > { %s2338_s9 = smov %s1531_s12  ;;  %16 = sbr.rel (!%p14_p4) target bundleno = 5 (0x5), region = 69 }
 0x205   :  { %1286 = vsyncpa [#allocation3], 1 }
 0x206   :  { %1288 = vsyncpa [#allocation3 + $0x1], 1 }
 0x207   :  { %1289 = vsyncpa [#allocation4], 1 }
 0x208   :  { %1291 = vsyncpa [#allocation4 + $0x1], 1 }

</bundles_post_ra>
